<compile_context>
chip_gen: v5e
topology: v5e:2x2
jax: 0.10.0
libtpu: 0.0.40
codegen_flags: <defaults>
</compile_context>

<pallas_src>
import functools

import jax
import jax.numpy as jnp
from jax.experimental import pallas as pl
from jax.experimental.pallas import tpu as pltpu


def _edge_sobel_kernel(hl_ref, lh_ref, out_ref, *, W, HW):
    # hl_ref / lh_ref / out_ref: (R, HW); each row is one flattened (H, W) plane.
    x = hl_ref[...].astype(jnp.float32)
    y = lh_ref[...].astype(jnp.float32)

    # In-kernel boundary-validity masks (replaces the old (4, HW) mask input).
    lane = jax.lax.broadcasted_iota(jnp.int32, x.shape, dimension=1)
    wpos = lane % W
    zero = jnp.zeros((), jnp.float32)

    # pltpu.roll follows jnp.roll semantics: result[l] = x[(l - shift) mod HW].
    # shift = HW-1 -> neighbour at lane l+1 (w+1);  shift = 1    -> lane l-1 (w-1)
    # shift = HW-W -> neighbour at lane l+W (h+1);  shift = W    -> lane l-W (h-1)
    # Wrapped lanes are exactly the out-of-image taps and are replaced by 0 via
    # jnp.where, reproducing Conv2d(padding=1) zero padding (NaN-safe).
    x_p1 = pltpu.roll(x, shift=HW - 1, axis=1)   # HL[h, w+1]
    x_m1 = pltpu.roll(x, shift=1, axis=1)        # HL[h, w-1]
    y_pW = pltpu.roll(y, shift=HW - W, axis=1)   # LH[h+1, w]
    y_mW = pltpu.roll(y, shift=W, axis=1)        # LH[h-1, w]

    ex = jnp.where(wpos != W - 1, x_p1, zero) - jnp.where(wpos != 0, x_m1, zero)
    ey = jnp.where(lane < HW - W, y_pW, zero) - jnp.where(lane >= W, y_mW, zero)

    out_ref[...] = jnp.sqrt(ex * ex + ey * ey).astype(out_ref.dtype)


def _tune_for_backend():
    """Per-generation (block-budget bytes, scoped-VMEM limit bytes)."""
    try:
        kind = jax.devices()[0].device_kind.lower()
    except Exception:  # no TPU visible at trace time; use the conservative path
        kind = ""
    if "v5 lite" in kind or "v5lite" in kind or "v5e" in kind:
        # v5e: 2 MiB blocks already amortize the ~0.35 us/step overhead at
        # ~820 GB/s; keep the ~12 MiB live footprint under the 16 MiB default.
        return 2 << 20, 16 << 20
    # v6e / v7x (and fallback): 4 MiB input blocks -> ~24 MiB live footprint
    # (2 inputs x 2 buffers + output x 2 buffers), under an explicit 48 MiB limit
    # which fits both v6e (128 MiB) and v7x (64 MiB/TC) physical VMEM.
    return 4 << 20, 48 << 20


@jax.jit
def edge_forward(HL, LH):
    """HL, LH: (B, C, H, W). Returns sqrt(sobel_x(HL)**2 + sobel_y(LH)**2)."""
    assert HL.shape == LH.shape
    B, C, H, W = HL.shape
    HW = H * W
    NC = B * C

    # Pure view reshape (row-major): no extra HBM pass; native dtype preserved.
    # Note: if H*W is not a multiple of 128 the output stores become masked vst's
    # (accepted penalty for odd plane sizes; typical RDSF-Net planes are 2^k x 2^k).
    hl2 = HL.reshape(NC, HW)
    lh2 = LH.reshape(NC, HW)

    budget_bytes, vmem_limit = _tune_for_backend()

    # Row-block = number of fused planes per grid step (f32-equivalent budgeting).
    plane_bytes = HW * 4
    row_blk = max(1, budget_bytes // plane_bytes)
    if NC > 8:
        # Cap at ~ceil(NC/2) rounded up to 8 so the parallel grid axis has >= 2
        # steps and both v7x TensorCores get work.
        half = ((-(-NC // 2)) + 7) // 8 * 8
        row_blk = min(row_blk, half)
    if row_blk >= NC:
        row_blk = NC                             # full-extent block (always legal)
    else:
        row_blk = max(8, (row_blk // 8) * 8)     # (8, 128) sublane constraint

    # Safeguard: make sure the pipelined footprint fits the scoped-VMEM limit.
    vmem_limit = max(vmem_limit, min(6 * row_blk * HW * 4 + (2 << 20), 56 << 20))

    grid = (pl.cdiv(NC, row_blk),)
    kernel = functools.partial(_edge_sobel_kernel, W=W, HW=HW)

    out2 = pl.pallas_call(
        kernel,
        out_shape=jax.ShapeDtypeStruct((NC, HW), HL.dtype),
        grid=grid,
        in_specs=[
            pl.BlockSpec((row_blk, HW), lambda i: (i, 0)),  # HL planes
            pl.BlockSpec((row_blk, HW), lambda i: (i, 0)),  # LH planes
        ],
        out_specs=pl.BlockSpec((row_blk, HW), lambda i: (i, 0)),
        compiler_params=pltpu.CompilerParams(
            dimension_semantics=("parallel",),
            vmem_limit_bytes=int(vmem_limit)),
    )(hl2, lh2)

    return out2.reshape(B, C, H, W)


def _reference_edge(HL, LH):
    """Pure-JAX reference: depthwise conv with the frozen Sobel weights."""
    C = HL.shape[1]
    sobel_x = jnp.array([[0.0, 0.0, 0.0],
                         [-1.0, 0.0, 1.0],
                         [0.0, 0.0, 0.0]], dtype=jnp.float32)
    sobel_y = jnp.array([[0.0, -1.0, 0.0],
                         [0.0, 0.0, 0.0],
                         [0.0, 1.0, 0.0]], dtype=jnp.float32)
    wx = jnp.tile(sobel_x[None], (C, 1, 1)).reshape(C, 1, 3, 3)
    wy = jnp.tile(sobel_y[None], (C, 1, 1)).reshape(C, 1, 3, 3)
    dn = ("NCHW", "OIHW", "NCHW")
    ex = jax.lax.conv_general_dilated(
        HL.astype(jnp.float32), wx, (1, 1), "SAME",
        dimension_numbers=dn, feature_group_count=C)
    ey = jax.lax.conv_general_dilated(
        LH.astype(jnp.float32), wy, (1, 1), "SAME",
        dimension_numbers=dn, feature_group_count=C)
    return jnp.sqrt(ex * ex + ey * ey)


if __name__ == "__main__":
    key = jax.random.PRNGKey(0)

    # Case 1: module-sized demo (single grid step).
    B, C, H, W = 2, 4, 16, 16
    k1, k2, k3, k4 = jax.random.split(key, 4)
    HL = jax.random.normal(k1, (B, C, H, W), dtype=jnp.float32)
    LH = jax.random.normal(k2, (B, C, H, W), dtype=jnp.float32)
    out = jax.block_until_ready(edge_forward(HL, LH))
    ref = _reference_edge(HL, LH)
    assert out.shape == (B, C, H, W)
    assert jnp.allclose(out, ref, atol=1e-5, rtol=1e-5)

    # Case 2: enough planes to exercise a multi-step "parallel" grid.
    B2, C2 = 2, 16
    HL2 = jax.random.normal(k3, (B2, C2, H, W), dtype=jnp.float32)
    LH2 = jax.random.normal(k4, (B2, C2, H, W), dtype=jnp.float32)
    out2 = jax.block_until_ready(edge_forward(HL2, LH2))
    ref2 = _reference_edge(HL2, LH2)
    assert jnp.allclose(out2, ref2, atol=1e-5, rtol=1e-5)

    print("KERNEL_OK")
</pallas_src>

<mosaic_0001>
module attributes {stable_mosaic.version = 11 : i64} {
  func.func @_edge_sobel_kernel(%arg0: i32, %arg1: memref<8x256xf32, #tpu.memory_space<vmem>>, %arg2: memref<8x256xf32, #tpu.memory_space<vmem>>, %arg3: memref<8x256xf32, #tpu.memory_space<vmem>>) attributes {dimension_semantics = [#tpu.dimension_semantics<parallel>], iteration_bounds = array<i64: 1>, scalar_prefetch = 0 : i64, scratch_operands = 0 : i64, tpu.core_type = #tpu.core_type<tc>, window_params = [{transform_indices = @transform_0, window_bounds = array<i64: 8, 256>}, {transform_indices = @transform_1, window_bounds = array<i64: 8, 256>}, {transform_indices = @transform_2, window_bounds = array<i64: 8, 256>}]} {
    %c0 = arith.constant 0 : index
    %c0_0 = arith.constant 0 : index
    %0 = vector.load %arg1[%c0, %c0_0] : memref<8x256xf32, #tpu.memory_space<vmem>>, vector<8x256xf32>
    %c0_1 = arith.constant 0 : index
    %c0_2 = arith.constant 0 : index
    %1 = vector.load %arg2[%c0_1, %c0_2] : memref<8x256xf32, #tpu.memory_space<vmem>>, vector<8x256xf32>
    %2 = tpu.iota {dimensions = array<i32: 1>} : vector<8x256xi32>
    %c16_i32 = arith.constant 16 : i32
    %c0_i32 = arith.constant 0 : i32
    %3 = arith.cmpi eq, %c16_i32, %c0_i32 : i32
    %c1_i32 = arith.constant 1 : i32
    %4 = arith.select %3, %c1_i32, %c16_i32 : i32
    %5 = vector.broadcast %4 : i32 to vector<8x256xi32>
    %6 = arith.remsi %2, %5 : vector<8x256xi32>
    %c0_i32_3 = arith.constant 0 : i32
    %7 = vector.broadcast %c0_i32_3 : i32 to vector<8x256xi32>
    %8 = arith.cmpi ne, %6, %7 : vector<8x256xi32>
    %c0_i32_4 = arith.constant 0 : i32
    %9 = vector.broadcast %c0_i32_4 : i32 to vector<8x256xi32>
    %10 = arith.cmpi slt, %6, %9 : vector<8x256xi32>
    %c0_i32_5 = arith.constant 0 : i32
    %11 = arith.cmpi slt, %4, %c0_i32_5 : i32
    %12 = vector.broadcast %11 : i1 to vector<8x256xi1>
    %13 = vector.broadcast %12 : vector<8x256xi1> to vector<8x256xi1>
    %14 = arith.xori %10, %13 : vector<8x256xi1>
    %15 = arith.andi %14, %8 : vector<8x256xi1>
    %16 = vector.broadcast %4 : i32 to vector<8x256xi32>
    %17 = arith.addi %6, %16 : vector<8x256xi32>
    %18 = arith.select %15, %17, %6 : vector<8x256xi1>, vector<8x256xi32>
    %c255_i32 = arith.constant 255 : i32
    %19 = tpu.dynamic_rotate %0 by %c255_i32 dim 1 : vector<8x256xf32>, i32 -> vector<8x256xf32>
    %c1_i32_6 = arith.constant 1 : i32
    %20 = tpu.dynamic_rotate %0 by %c1_i32_6 dim 1 : vector<8x256xf32>, i32 -> vector<8x256xf32>
    %c240_i32 = arith.constant 240 : i32
    %21 = tpu.dynamic_rotate %1 by %c240_i32 dim 1 : vector<8x256xf32>, i32 -> vector<8x256xf32>
    %c16_i32_7 = arith.constant 16 : i32
    %22 = tpu.dynamic_rotate %1 by %c16_i32_7 dim 1 : vector<8x256xf32>, i32 -> vector<8x256xf32>
    %c15_i32 = arith.constant 15 : i32
    %23 = vector.broadcast %c15_i32 : i32 to vector<8x256xi32>
    %24 = arith.cmpi ne, %18, %23 : vector<8x256xi32>
    %cst = arith.constant 0.000000e+00 : f32
    %25 = vector.broadcast %cst : f32 to vector<8x256xf32>
    %26 = arith.select %24, %19, %25 : vector<8x256xi1>, vector<8x256xf32>
    %c0_i32_8 = arith.constant 0 : i32
    %27 = vector.broadcast %c0_i32_8 : i32 to vector<8x256xi32>
    %28 = arith.cmpi ne, %18, %27 : vector<8x256xi32>
    %cst_9 = arith.constant 0.000000e+00 : f32
    %29 = vector.broadcast %cst_9 : f32 to vector<8x256xf32>
    %30 = arith.select %28, %20, %29 : vector<8x256xi1>, vector<8x256xf32>
    %31 = arith.subf %26, %30 : vector<8x256xf32>
    %c240_i32_10 = arith.constant 240 : i32
    %32 = vector.broadcast %c240_i32_10 : i32 to vector<8x256xi32>
    %33 = arith.cmpi slt, %2, %32 : vector<8x256xi32>
    %cst_11 = arith.constant 0.000000e+00 : f32
    %34 = vector.broadcast %cst_11 : f32 to vector<8x256xf32>
    %35 = arith.select %33, %21, %34 : vector<8x256xi1>, vector<8x256xf32>
    %c16_i32_12 = arith.constant 16 : i32
    %36 = vector.broadcast %c16_i32_12 : i32 to vector<8x256xi32>
    %37 = arith.cmpi sge, %2, %36 : vector<8x256xi32>
    %cst_13 = arith.constant 0.000000e+00 : f32
    %38 = vector.broadcast %cst_13 : f32 to vector<8x256xf32>
    %39 = arith.select %37, %22, %38 : vector<8x256xi1>, vector<8x256xf32>
    %40 = arith.subf %35, %39 : vector<8x256xf32>
    %41 = arith.mulf %31, %31 : vector<8x256xf32>
    %42 = arith.mulf %40, %40 : vector<8x256xf32>
    %43 = arith.addf %41, %42 : vector<8x256xf32>
    %44 = math.sqrt %43 : vector<8x256xf32>
    %c0_14 = arith.constant 0 : index
    %c0_15 = arith.constant 0 : index
    %45 = vector.load %arg3[%c0_14, %c0_15] : memref<8x256xf32, #tpu.memory_space<vmem>>, vector<8x256xf32>
    tpu.vector_store %arg3[%c0_14, %c0_15], %44 {strides = array<i32>} : memref<8x256xf32, #tpu.memory_space<vmem>>, vector<8x256xf32>,
    return
  }
  func.func @transform_0(%arg0: i32) -> (i32, i32) {
    %c0_i32 = arith.constant 0 : i32
    %c0_i32_0 = arith.constant 0 : i32
    return %arg0, %c0_i32 : i32, i32
  }
  func.func @transform_1(%arg0: i32) -> (i32, i32) {
    %c0_i32 = arith.constant 0 : i32
    %c0_i32_0 = arith.constant 0 : i32
    return %arg0, %c0_i32 : i32, i32
  }
  func.func @transform_2(%arg0: i32) -> (i32, i32) {
    %c0_i32 = arith.constant 0 : i32
    %c0_i32_0 = arith.constant 0 : i32
    return %arg0, %c0_i32 : i32, i32
  }
}

</mosaic_0001>

<bundles_post_ra>
// kernel: edge_forward.1
= control target key start
LH: loop header
LB: loop body
LE: loop exit
PB: predicated region body
PF: predicated region fallthrough
CT: control target
= control target key end

     0   :  { %s134_s11 = smov 1   ;;  %s135_s12 = smov 127   ;;  %v15_v4 = vlaneseq  ;;  %s185_s0 = inlined_call_operand.vmem [shape: f32[8,256], index: 0, kind: input, shape index: {}]   ;;  %s186_s1 = inlined_call_operand.vmem [shape: f32[8,256], index: 1, kind: input, shape index: {}]   ;;  %s187_s2 = inlined_call_operand.vmem [shape: f32[8,256], index: 2, kind: output, shape index: {}]  }
   0x1   :  { %v11_v0 = vld [vmem:[%s185_s0] sm:$0xff]  ;;  %s136_s15 = smov 112   ;;  %v12_v2 = vld [vmem:[%s185_s0 + $0x8] sm:$0xff]  ;;  %s137_s20 = smov 16  }
   0x2   :  { %49 = vrot.lane.b32.xlu1 %v11_v0, %s134_s11  ;;  %42 = vrot.lane.b32.xlu0 %v11_v0, %s135_s12  ;;  %v13_v1 = vld [vmem:[%s186_s1] sm:$0xff]  ;;  %v14_v3 = vld [vmem:[%s186_s1 + $0x8] sm:$0xff]  ;;  %v16_v5 = vand.u32 127, %v15_v4 }
   0x3   :  { %56 = vrot.lane.b32.xlu2 %v13_v1, %s136_s15 }
   0x4   :  { %v17_v9 = vadd.s32 128, %v16_v5  ;;  %v22_v11 = vand.u32 15, %v16_v5  ;;  %vm53_vm0 = vcmp.lt.s32.totalorder %v16_v5, 1  ;;  %vm46_vm1 = vcmp.lt.s32.totalorder %v16_v5, 127 }
   0x5   :  { %vm60_vm2 = vcmp.lt.s32.totalorder %v16_v5, 112  ;;  %vm67_vm8 = vcmp.lt.s32.totalorder %v16_v5, 16  ;;  %vm84_vm9 = vcmp.ge.s32.totalorder %v16_v5, 16 }
   0x6   :  { %v29_v10 = vand.u32 15, %v17_v9  ;;  %vm169_vm5 = vcmp.ne.s32.totalorder %v22_v11, 0  ;;  %vm70_vm6 = vcmp.ne.s32.totalorder %v22_v11, 15  ;;  %vm81_vm7 = vcmp.lt.s32.totalorder %v17_v9, 240 }
   0x8   :  { %vm165_vm3 = vcmp.ne.s32.totalorder %v29_v10, 0  ;;  %vm71_vm4 = vcmp.ne.s32.totalorder %v29_v10, 15 }
   0xa   :  { %51 = vrot.lane.b32.xlu1 %v12_v2, %s134_s11  ;;  %44 = vrot.lane.b32.xlu0 %v12_v2, %s135_s12 }
   0xb   :  { %58 = vrot.lane.b32.xlu2 %v14_v3, %s136_s15 }
  0x12   :  { %65 = vrot.lane.b32.xlu1 %v14_v3, %s137_s20  ;;  %63 = vrot.lane.b32.xlu0 %v13_v1, %s137_s20 }
  0x5d   :  { %v57_v8 = vpop.permute.xlu2 %56 }
  0x65   :  { %v59_v17 = vpop.permute.xlu2 %58 }
  0x66   :  { %v62_v23 = vsel %vm60_vm2, %v59_v17, %v57_v8  ;;  %v61_v33 = vsel %vm60_vm2, %v57_v8, %v59_v17 }
  0x67   :  { %v83_v29 = vsel %vm81_vm7, %v62_v23, 0.0 }
  0x74   :  { %v50_v6 = vpop.permute.xlu1 %49  ;;  %v43_v7 = vpop.permute.xlu0 %42 }
  0x7c   :  { %v52_v12 = vpop.permute.xlu1 %51  ;;  %v45_v13 = vpop.permute.xlu0 %44 }
  0x7d   :  { %v54_v15 = vsel %vm53_vm0, %v50_v6, %v52_v12  ;;  %v48_v16 = vsel %vm46_vm1, %v45_v13, %v43_v7  ;;  %v55_v19 = vsel %vm53_vm0, %v52_v12, %v50_v6  ;;  %v47_v20 = vsel %vm46_vm1, %v43_v7, %v45_v13 }
  0x7e   :  { %v77_v21 = vsel %vm165_vm3, %v54_v15, 0.0  ;;  %v73_v22 = vsel %vm71_vm4, %v48_v16, 0.0  ;;  %v76_v24 = vsel %vm169_vm5, %v55_v19, 0.0  ;;  %v72_v25 = vsel %vm70_vm6, %v47_v20, 0.0 }
  0x7f   :  { %v79_v26 = vsub.f32 %v73_v22, %v77_v21  ;;  %v78_v30 = vsub.f32 %v72_v25, %v76_v24 }
  0x81   :  { %v91_v37 = vmul.f32 %v79_v26, %v79_v26  ;;  %v90_v39 = vmul.f32 %v78_v30, %v78_v30 }
  0x84   :  { %v66_v27 = vpop.permute.xlu1 %65  ;;  %v64_v28 = vpop.permute.xlu0 %63 }
  0x85   :  { %v68_v31 = vsel %vm67_vm8, %v64_v28, %v66_v27  ;;  %v69_v32 = vsel %vm67_vm8, %v66_v27, %v64_v28 }
  0x86   :  { %v86_v34 = vsel %vm84_vm9, %v69_v32, 0.0  ;;  %v89_v35 = vsub.f32 %v83_v29, %v68_v31 }
  0x87   :  { %v88_v36 = vsub.f32 %v61_v33, %v86_v34 }
  0x88   :  { %v93_v38 = vmul.f32 %v89_v35, %v89_v35 }
  0x89   :  { %v92_v40 = vmul.f32 %v88_v36, %v88_v36 }
  0x8a   :  { %v95_v41 = vadd.f32 %v93_v38, %v91_v37 }
  0x8b   :  { %v94_v42 = vadd.f32 %v92_v40, %v90_v39 }
  0x8c   :  { %130 = vrsqrt.f32 %v95_v41  ;;  %vm115_vm10 = vcmp.eq.f32.partialorder %v95_v41, inf  ;;  %v118_v57 = vand.u32 2147483648, %v95_v41  ;;  %vm117_vm12 = vcmp.eq.f32.partialorder %v95_v41, 0.0 }
  0x8d   :  { %132 = vrsqrt.f32 %v94_v42  ;;  %vm103_vm11 = vcmp.eq.f32.partialorder %v94_v42, inf  ;;  %v106_v58 = vand.u32 2147483648, %v94_v42  ;;  %vm105_vm13 = vcmp.eq.f32.partialorder %v94_v42, 0.0 }
  0x92   :  { %v131_v43 = vpop.eup %130 }
  0x93   :  { %v133_v44 = vpop.eup %132  ;;  %v109_v45 = vmul.f32 %v131_v43, %v95_v41 }
  0x94   :  { %v97_v46 = vmul.f32 %v133_v44, %v94_v42 }
  0x95   :  { %v110_v47 = vmul.f32 %v131_v43, %v109_v45 }
  0x96   :  { %v98_v48 = vmul.f32 %v133_v44, %v97_v46 }
  0x97   :  { %v111_v49 = vmul.f32 0.5, %v110_v47 }
  0x98   :  { %v99_v50 = vmul.f32 0.5, %v98_v48 }
  0x99   :  { %v112_v51 = vsub.f32 1.5, %v111_v49 }
  0x9a   :  { %v100_v52 = vsub.f32 1.5, %v99_v50 }
  0x9b   :  { %v113_v53 = vmul.f32 %v131_v43, %v112_v51 }
  0x9c   :  { %v101_v54 = vmul.f32 %v133_v44, %v100_v52 }
  0x9d   :  { %v114_v55 = vmul.f32 %v113_v53, %v95_v41 }
  0x9e   :  { %v102_v56 = vmul.f32 %v101_v54, %v94_v42 }
  0x9f   :  { %v116_v59 = vsel %vm115_vm10, %v95_v41, %v114_v55 }
  0xa0   :  { %v104_v60 = vsel %vm103_vm11, %v94_v42, %v102_v56  ;;  %v119_v61 = vsel %vm117_vm12, %v118_v57, %v116_v59 }
  0xa1   :  { %v107_v62 = vsel %vm105_vm13, %v106_v58, %v104_v60  ;;  %121 = vst [vmem:[%s187_s2 + $0x8] sm:$0xff] %v119_v61 }
  0xa2   :  { %120 = vst [vmem:[%s187_s2] sm:$0xff] %v107_v62 }

</bundles_post_ra>
